<compile_context>
chip_gen: v6e
topology: v6e:2x2x1
jax: 0.10.0
libtpu: 0.0.40
codegen_flags: <defaults>
</compile_context>

<pallas_src>
import jax
import jax.numpy as jnp
import numpy as np
from jax.experimental import pallas as pl
from jax.experimental.pallas import tpu as pltpu

# ---- module hyper-parameters (small synthetic sizes) ----
DIM = 4            # input channels
DIM_OUT = 32       # output channels
GROUPS = 8         # GroupNorm groups (DIM_OUT % GROUPS == 0)
B, H, W = 2, 16, 16
N = H * W          # 256 pixels -> lane-dense last dim (2 x 128 lanes)
K = 3              # conv kernel size
EPS = 1e-5         # PyTorch GroupNorm default eps


def _block_body(xcol_ref, w_ref, bconv_ref, gamma_ref, beta_ref, gavg_ref,
                scale_ref, shift_ref, o_ref):
    """Shared kernel body.  All arrays use a (channels, pixels) layout.

    xcol_ref : (B, K*K*C_in, N)   im2col'd input (tap-major on sublanes)
    w_ref    : (C_out, K*K*C_in)  conv weight, tap-major (matches xcol)
    bconv_ref: (C_out, 1)         conv bias
    gamma_ref: (C_out, 1)         GroupNorm weight
    beta_ref : (C_out, 1)         GroupNorm bias
    gavg_ref : (C_out, C_out)     block-diagonal group-averaging matrix
                                  (1/(cpg*N) within a group, 0 elsewhere)
    scale_ref/shift_ref : (B, C_out, 1) or None (optional modulation)
    o_ref    : (B, C_out, N)
    """
    w = w_ref[...]
    bconv = bconv_ref[...]
    gamma = gamma_ref[...]
    beta = beta_ref[...]
    gavg = gavg_ref[...]

    n_batch = xcol_ref.shape[0]
    for b in range(n_batch):
        xcol = xcol_ref[b]                                            # (K*K*C_in, N)
        # 3x3 conv == one MXU matmul per sample in this layout.
        z = jnp.dot(w, xcol, preferred_element_type=jnp.float32) + bconv   # (C_out, N)

        # GroupNorm: per-channel lane reductions + tiny group-averaging matmul
        # (spreads/averages sums within each channel group, no sublane reshapes).
        s1 = jnp.sum(z, axis=-1, keepdims=True)                       # (C_out, 1)
        s2 = jnp.sum(z * z, axis=-1, keepdims=True)                   # (C_out, 1)
        mean = jnp.dot(gavg, s1, preferred_element_type=jnp.float32)  # group mean per channel
        ex2 = jnp.dot(gavg, s2, preferred_element_type=jnp.float32)   # group E[x^2] per channel
        var = ex2 - mean * mean
        inv = jax.lax.rsqrt(var + EPS)                                # EUP
        y = (z - mean) * (inv * gamma) + beta

        if scale_ref is not None:
            y = y * (scale_ref[b] + 1.0) + shift_ref[b]

        # SiLU
        y = y * jax.nn.sigmoid(y)                                     # EUP logistic
        o_ref[b] = y.astype(o_ref.dtype)


def _block_kernel(xcol_ref, w_ref, bconv_ref, gamma_ref, beta_ref, gavg_ref,
                  o_ref):
    _block_body(xcol_ref, w_ref, bconv_ref, gamma_ref, beta_ref, gavg_ref,
                None, None, o_ref)


def _block_kernel_scale_shift(xcol_ref, w_ref, bconv_ref, gamma_ref, beta_ref,
                              gavg_ref, scale_ref, shift_ref, o_ref):
    _block_body(xcol_ref, w_ref, bconv_ref, gamma_ref, beta_ref, gavg_ref,
                scale_ref, shift_ref, o_ref)


def block_pallas(x, w_conv, b_conv, gn_weight, gn_bias, scale_shift=None,
                 groups=GROUPS):
    """Forward pass of `Block`.

    x: (B, C_in, H, W) NCHW; w_conv: (C_out, C_in, 3, 3); b_conv/gn_*: (C_out,);
    scale_shift: optional ((B, C_out, 1, 1), (B, C_out, 1, 1)).
    Returns (B, C_out, H, W).
    """
    b, c_in, h, w = x.shape
    n = h * w
    c_out = w_conv.shape[0]
    cpg = c_out // groups

    # Host-side prep: only pad + strided slices + reshapes (no activation
    # transposes; NCHW -> (B, C, N) is a free, contiguous reshape).
    x_pad = jnp.pad(x, ((0, 0), (0, 0), (1, 1), (1, 1)))
    cols = []
    for ky in range(K):
        for kx in range(K):
            cols.append(x_pad[:, :, ky:ky + h, kx:kx + w].reshape(b, c_in, n))
    xcol = jnp.concatenate(cols, axis=1)                     # (B, K*K*C_in, N)

    # Conv weight (C_out, C_in, K, K) -> (C_out, K*K*C_in), tap-major to match
    # xcol's (ky, kx, ci) ordering.  Tiny constants, prepped once per call.
    w_mat = jnp.transpose(w_conv, (0, 2, 3, 1)).reshape(c_out, K * K * c_in)
    bconv_2d = b_conv.reshape(c_out, 1)
    gamma_2d = gn_weight.reshape(c_out, 1)
    beta_2d = gn_bias.reshape(c_out, 1)

    # Block-diagonal group averaging matrix: gavg @ per_channel_sums gives the
    # per-channel *group* mean (already divided by cpg * N).
    gid = jnp.arange(c_out) // cpg
    gavg = (gid[:, None] == gid[None, :]).astype(jnp.float32) / float(cpg * n)

    vmem_spec = pl.BlockSpec(memory_space=pltpu.MemorySpace.VMEM)
    out_shape = jax.ShapeDtypeStruct((b, c_out, n), x.dtype)

    if scale_shift is None:
        kernel = _block_kernel
        inputs = (xcol, w_mat, bconv_2d, gamma_2d, beta_2d, gavg)
    else:
        scale, shift = scale_shift
        kernel = _block_kernel_scale_shift
        inputs = (xcol, w_mat, bconv_2d, gamma_2d, beta_2d, gavg,
                  scale.reshape(b, c_out, 1), shift.reshape(b, c_out, 1))

    out = pl.pallas_call(
        kernel,
        out_shape=out_shape,
        in_specs=[vmem_spec] * len(inputs),
        out_specs=vmem_spec,
    )(*inputs)

    # (B, C_out, N) -> NCHW is a free reshape (no transpose).
    return out.reshape(b, c_out, h, w)


def block_reference(x, w_conv, b_conv, gn_weight, gn_bias, scale_shift=None,
                    groups=GROUPS):
    """Pure-JAX reference mirroring the PyTorch forward exactly."""
    out = jax.lax.conv_general_dilated(
        x, w_conv, window_strides=(1, 1), padding=((1, 1), (1, 1)),
        dimension_numbers=('NCHW', 'OIHW', 'NCHW'),
        precision=jax.lax.Precision.HIGHEST)
    out = out + b_conv[None, :, None, None]
    b, c, h, w = out.shape
    xg = out.reshape(b, groups, c // groups, h, w)
    mean = jnp.mean(xg, axis=(2, 3, 4), keepdims=True)
    var = jnp.mean((xg - mean) ** 2, axis=(2, 3, 4), keepdims=True)
    xg = (xg - mean) / jnp.sqrt(var + EPS)
    out = xg.reshape(b, c, h, w)
    out = out * gn_weight[None, :, None, None] + gn_bias[None, :, None, None]
    if scale_shift is not None:
        scale, shift = scale_shift
        out = out * (scale + 1.0) + shift
    return out * jax.nn.sigmoid(out)


if __name__ == "__main__":
    key = jax.random.PRNGKey(0)
    ks = jax.random.split(key, 7)

    x = jax.random.normal(ks[0], (B, DIM, H, W), dtype=jnp.float32)
    w_conv = 0.1 * jax.random.normal(ks[1], (DIM_OUT, DIM, K, K), dtype=jnp.float32)
    b_conv = 0.05 * jax.random.normal(ks[2], (DIM_OUT,), dtype=jnp.float32)
    gn_w = 1.0 + 0.1 * jax.random.normal(ks[3], (DIM_OUT,), dtype=jnp.float32)
    gn_b = 0.05 * jax.random.normal(ks[4], (DIM_OUT,), dtype=jnp.float32)
    scale = 0.1 * jax.random.normal(ks[5], (B, DIM_OUT, 1, 1), dtype=jnp.float32)
    shift = 0.1 * jax.random.normal(ks[6], (B, DIM_OUT, 1, 1), dtype=jnp.float32)

    # Default path (scale_shift=None)
    out = block_pallas(x, w_conv, b_conv, gn_w, gn_b)
    out = jax.block_until_ready(out)
    ref = block_reference(x, w_conv, b_conv, gn_w, gn_b)
    np.testing.assert_allclose(np.asarray(out), np.asarray(ref),
                               rtol=1e-4, atol=1e-4)

    # scale_shift path (as used inside ResnetBlock)
    out_ss = block_pallas(x, w_conv, b_conv, gn_w, gn_b,
                          scale_shift=(scale, shift))
    out_ss = jax.block_until_ready(out_ss)
    ref_ss = block_reference(x, w_conv, b_conv, gn_w, gn_b,
                             scale_shift=(scale, shift))
    np.testing.assert_allclose(np.asarray(out_ss), np.asarray(ref_ss),
                               rtol=1e-4, atol=1e-4)

    print("KERNEL_OK")
</pallas_src>

<mosaic_0001>
module attributes {stable_mosaic.version = 11 : i64} {
  func.func @_block_kernel(%arg0: memref<2x36x256xf32, #tpu.memory_space<vmem>>, %arg1: memref<32x36xf32, #tpu.memory_space<vmem>>, %arg2: memref<32x1xf32, #tpu.memory_space<vmem>>, %arg3: memref<32x1xf32, #tpu.memory_space<vmem>>, %arg4: memref<32x1xf32, #tpu.memory_space<vmem>>, %arg5: memref<32x32xf32, #tpu.memory_space<vmem>>, %arg6: memref<2x32x256xf32, #tpu.memory_space<vmem>>) attributes {dimension_semantics = [], scalar_prefetch = 0 : i64, scratch_operands = 0 : i64, tpu.core_type = #tpu.core_type<tc>} {
    %c0 = arith.constant 0 : index
    %c0_0 = arith.constant 0 : index
    %0 = vector.load %arg1[%c0, %c0_0] : memref<32x36xf32, #tpu.memory_space<vmem>>, vector<32x36xf32>
    %c0_1 = arith.constant 0 : index
    %c0_2 = arith.constant 0 : index
    %1 = vector.load %arg2[%c0_1, %c0_2] : memref<32x1xf32, #tpu.memory_space<vmem>>, vector<32x1xf32>
    %c0_3 = arith.constant 0 : index
    %c0_4 = arith.constant 0 : index
    %2 = vector.load %arg3[%c0_3, %c0_4] : memref<32x1xf32, #tpu.memory_space<vmem>>, vector<32x1xf32>
    %c0_5 = arith.constant 0 : index
    %c0_6 = arith.constant 0 : index
    %3 = vector.load %arg4[%c0_5, %c0_6] : memref<32x1xf32, #tpu.memory_space<vmem>>, vector<32x1xf32>
    %c0_7 = arith.constant 0 : index
    %c0_8 = arith.constant 0 : index
    %4 = vector.load %arg5[%c0_7, %c0_8] : memref<32x32xf32, #tpu.memory_space<vmem>>, vector<32x32xf32>
    %c0_9 = arith.constant 0 : index
    %c0_10 = arith.constant 0 : index
    %c0_11 = arith.constant 0 : index
    %5 = vector.load %arg0[%c0_9, %c0_10, %c0_11] : memref<2x36x256xf32, #tpu.memory_space<vmem>>, vector<1x36x256xf32>
    %6 = vector.shape_cast %5 : vector<1x36x256xf32> to vector<36x256xf32>
    %cst = arith.constant dense<0.000000e+00> : vector<32x256xf32>
    %7 = tpu.matmul %0, %6, %cst {dimension_numbers = #tpu.dot_dimension_numbers<[1], [0], [0], [1], [0, 0, 1, 1], [], []>} : vector<32x36xf32>, vector<36x256xf32>, vector<32x256xf32> -> vector<32x256xf32>
    %8 = vector.broadcast %1 : vector<32x1xf32> to vector<32x256xf32>
    %9 = arith.addf %7, %8 : vector<32x256xf32>
    %cst_12 = arith.constant dense<0.000000e+00> : vector<32xf32>
    %10 = vector.multi_reduction <add>, %9, %cst_12 [1] : vector<32x256xf32> to vector<32xf32>
    %11 = vector.shape_cast %10 : vector<32xf32> to vector<32x1xf32>
    %12 = arith.mulf %9, %9 : vector<32x256xf32>
    %cst_13 = arith.constant dense<0.000000e+00> : vector<32xf32>
    %13 = vector.multi_reduction <add>, %12, %cst_13 [1] : vector<32x256xf32> to vector<32xf32>
    %14 = vector.shape_cast %13 : vector<32xf32> to vector<32x1xf32>
    %cst_14 = arith.constant dense<0.000000e+00> : vector<32x1xf32>
    %15 = tpu.matmul %4, %11, %cst_14 {dimension_numbers = #tpu.dot_dimension_numbers<[1], [0], [0], [1], [0, 0, 1, 1], [], []>} : vector<32x32xf32>, vector<32x1xf32>, vector<32x1xf32> -> vector<32x1xf32>
    %cst_15 = arith.constant dense<0.000000e+00> : vector<32x1xf32>
    %16 = tpu.matmul %4, %14, %cst_15 {dimension_numbers = #tpu.dot_dimension_numbers<[1], [0], [0], [1], [0, 0, 1, 1], [], []>} : vector<32x32xf32>, vector<32x1xf32>, vector<32x1xf32> -> vector<32x1xf32>
    %17 = arith.mulf %15, %15 : vector<32x1xf32>
    %18 = arith.subf %16, %17 : vector<32x1xf32>
    %cst_16 = arith.constant 9.99999974E-6 : f32
    %19 = vector.broadcast %cst_16 : f32 to vector<32x1xf32>
    %20 = arith.addf %18, %19 : vector<32x1xf32>
    %21 = math.rsqrt %20 : vector<32x1xf32>
    %22 = vector.broadcast %15 : vector<32x1xf32> to vector<32x256xf32>
    %23 = arith.subf %9, %22 : vector<32x256xf32>
    %24 = arith.mulf %21, %2 : vector<32x1xf32>
    %25 = vector.broadcast %24 : vector<32x1xf32> to vector<32x256xf32>
    %26 = arith.mulf %23, %25 : vector<32x256xf32>
    %27 = vector.broadcast %3 : vector<32x1xf32> to vector<32x256xf32>
    %28 = arith.addf %26, %27 : vector<32x256xf32>
    %29 = arith.negf %28 : vector<32x256xf32>
    %30 = math.exp %29 : vector<32x256xf32>
    %cst_17 = arith.constant 1.000000e+00 : f32
    %31 = vector.broadcast %cst_17 : f32 to vector<32x256xf32>
    %32 = arith.addf %31, %30 : vector<32x256xf32>
    %33 = arith.divf %31, %32 : vector<32x256xf32>
    %34 = arith.mulf %28, %33 : vector<32x256xf32>
    %c0_18 = arith.constant 0 : index
    %c0_19 = arith.constant 0 : index
    %c0_20 = arith.constant 0 : index
    %35 = vector.load %arg6[%c0_18, %c0_19, %c0_20] : memref<2x32x256xf32, #tpu.memory_space<vmem>>, vector<1x32x256xf32>
    %36 = vector.shape_cast %35 : vector<1x32x256xf32> to vector<32x256xf32>
    %37 = vector.shape_cast %34 : vector<32x256xf32> to vector<1x32x256xf32>
    tpu.vector_store %arg6[%c0_18, %c0_19, %c0_20], %37 {strides = array<i32>} : memref<2x32x256xf32, #tpu.memory_space<vmem>>, vector<1x32x256xf32>,
    %c1 = arith.constant 1 : index
    %c0_21 = arith.constant 0 : index
    %c0_22 = arith.constant 0 : index
    %38 = vector.load %arg0[%c1, %c0_21, %c0_22] : memref<2x36x256xf32, #tpu.memory_space<vmem>>, vector<1x36x256xf32>
    %39 = vector.shape_cast %38 : vector<1x36x256xf32> to vector<36x256xf32>
    %cst_23 = arith.constant dense<0.000000e+00> : vector<32x256xf32>
    %40 = tpu.matmul %0, %39, %cst_23 {dimension_numbers = #tpu.dot_dimension_numbers<[1], [0], [0], [1], [0, 0, 1, 1], [], []>} : vector<32x36xf32>, vector<36x256xf32>, vector<32x256xf32> -> vector<32x256xf32>
    %41 = vector.broadcast %1 : vector<32x1xf32> to vector<32x256xf32>
    %42 = arith.addf %40, %41 : vector<32x256xf32>
    %cst_24 = arith.constant dense<0.000000e+00> : vector<32xf32>
    %43 = vector.multi_reduction <add>, %42, %cst_24 [1] : vector<32x256xf32> to vector<32xf32>
    %44 = vector.shape_cast %43 : vector<32xf32> to vector<32x1xf32>
    %45 = arith.mulf %42, %42 : vector<32x256xf32>
    %cst_25 = arith.constant dense<0.000000e+00> : vector<32xf32>
    %46 = vector.multi_reduction <add>, %45, %cst_25 [1] : vector<32x256xf32> to vector<32xf32>
    %47 = vector.shape_cast %46 : vector<32xf32> to vector<32x1xf32>
    %cst_26 = arith.constant dense<0.000000e+00> : vector<32x1xf32>
    %48 = tpu.matmul %4, %44, %cst_26 {dimension_numbers = #tpu.dot_dimension_numbers<[1], [0], [0], [1], [0, 0, 1, 1], [], []>} : vector<32x32xf32>, vector<32x1xf32>, vector<32x1xf32> -> vector<32x1xf32>
    %cst_27 = arith.constant dense<0.000000e+00> : vector<32x1xf32>
    %49 = tpu.matmul %4, %47, %cst_27 {dimension_numbers = #tpu.dot_dimension_numbers<[1], [0], [0], [1], [0, 0, 1, 1], [], []>} : vector<32x32xf32>, vector<32x1xf32>, vector<32x1xf32> -> vector<32x1xf32>
    %50 = arith.mulf %48, %48 : vector<32x1xf32>
    %51 = arith.subf %49, %50 : vector<32x1xf32>
    %cst_28 = arith.constant 9.99999974E-6 : f32
    %52 = vector.broadcast %cst_28 : f32 to vector<32x1xf32>
    %53 = arith.addf %51, %52 : vector<32x1xf32>
    %54 = math.rsqrt %53 : vector<32x1xf32>
    %55 = vector.broadcast %48 : vector<32x1xf32> to vector<32x256xf32>
    %56 = arith.subf %42, %55 : vector<32x256xf32>
    %57 = arith.mulf %54, %2 : vector<32x1xf32>
    %58 = vector.broadcast %57 : vector<32x1xf32> to vector<32x256xf32>
    %59 = arith.mulf %56, %58 : vector<32x256xf32>
    %60 = vector.broadcast %3 : vector<32x1xf32> to vector<32x256xf32>
    %61 = arith.addf %59, %60 : vector<32x256xf32>
    %62 = arith.negf %61 : vector<32x256xf32>
    %63 = math.exp %62 : vector<32x256xf32>
    %cst_29 = arith.constant 1.000000e+00 : f32
    %64 = vector.broadcast %cst_29 : f32 to vector<32x256xf32>
    %65 = arith.addf %64, %63 : vector<32x256xf32>
    %66 = arith.divf %64, %65 : vector<32x256xf32>
    %67 = arith.mulf %61, %66 : vector<32x256xf32>
    %c1_30 = arith.constant 1 : index
    %c0_31 = arith.constant 0 : index
    %c0_32 = arith.constant 0 : index
    %68 = vector.load %arg6[%c1_30, %c0_31, %c0_32] : memref<2x32x256xf32, #tpu.memory_space<vmem>>, vector<1x32x256xf32>
    %69 = vector.shape_cast %68 : vector<1x32x256xf32> to vector<32x256xf32>
    %70 = vector.shape_cast %67 : vector<32x256xf32> to vector<1x32x256xf32>
    tpu.vector_store %arg6[%c1_30, %c0_31, %c0_32], %70 {strides = array<i32>} : memref<2x32x256xf32, #tpu.memory_space<vmem>>, vector<1x32x256xf32>,
    return
  }
}

</mosaic_0001>

<bundles_post_ra>
// kernel: tpu_custom_call.1
= control target key start
LH: loop header
LB: loop body
LE: loop exit
PB: predicated region body
PF: predicated region fallthrough
CT: control target
= control target key end

     0   :  { %vm87_vm0 = vcmask 1043456   ;;  %v1290_v5 = vmov 0.0   ;;  %v1291_v7 = vmov 0   ;;  %vm74_vm1 = vcmask 293888   ;;  %s1667_s0 = inlined_call_operand.vmem [shape: f32[2,36,256], index: 0, kind: input, shape index: {}]   ;;  %s1668_s1 = inlined_call_operand.vmem [shape: f32[32,36], index: 1, kind: input, shape index: {}]   ;;  %s1669_s2 = inlined_call_operand.vmem [shape: f32[32,1], index: 2, kind: input, shape index: {}]   ;;  %s1670_s3 = inlined_call_operand.vmem [shape: f32[32,1], index: 3, kind: input, shape index: {}]   ;;  %s1671_s4 = inlined_call_operand.vmem [shape: f32[32,1], index: 4, kind: input, shape index: {}]   ;;  %s1672_s5 = inlined_call_operand.vmem [shape: f32[32,32], index: 5, kind: input, shape index: {}]   ;;  %s1673_s6 = inlined_call_operand.hbm [shape: f32[2,32,256], index: 6, kind: output, shape index: {}]  }
   0x1   :  { %v53_v0 = vld [vmem:[%s1667_s0 + $0x48] sm:$0xf]  ;;  %v52_v1 = vld [vmem:[%s1667_s0 + $0x40] sm:$0xf]  ;;  %v51_v2 = vld [vmem:[%s1667_s0 + $0x38] sm:$0xff]  ;;  %158 = vmatprep.mubr.f32.mxu0 %v1290_v5  ;;  %1187 = vset.pattern.permute.xlu1 %v1291_v7 }
   0x2   :  { %1039 = vmatprep.subr.msk.mxu0 %vm87_vm0, %v53_v0  ;;  %v50_v3 = vld [vmem:[%s1667_s0 + $0x30] sm:$0xff]  ;;  %v49_v4 = vld [vmem:[%s1667_s0 + $0x28] sm:$0xff]  ;;  %v48_v6 = vld [vmem:[%s1667_s0 + $0x20] sm:$0xff]  ;;  %1186 = vset.pattern.permute.xlu0 %v1291_v7 }
   0x3   :  { %1040 = vmatpush1.msk.msra.mxu0 %vm87_vm0, %v52_v1  ;;  %v47_v8 = vld [vmem:[%s1667_s0 + $0x18] sm:$0xff]  ;;  %v46_v9 = vld [vmem:[%s1667_s0 + $0x10] sm:$0xff]  ;;  %v45_v10 = vld [vmem:[%s1667_s0 + $0x8] sm:$0xff] }
   0x4   :  { %118 = vmatprep.subr.mxu0 %v51_v2  ;;  %v44_v11 = vld [vmem:[%s1667_s0] sm:$0xff]  ;;  %v1070_v13 = vld [vmem:[%s1667_s0 + $0x98] sm:$0xf]  ;;  %v29_v14 = vld [vmem:[%s1669_s2 + $0x8] sm:$0xff] }
   0x5   :  { %119 = vmatpush1.msra.mxu0 %v50_v3  ;;  %v24_v12 = vld [vmem:[%s1668_s1] sm:$0xff]  ;;  %v31_v15 = vld [vmem:[%s1669_s2 + $0x18] sm:$0xff]  ;;  %v1069_v16 = vld [vmem:[%s1667_s0 + $0x90] sm:$0xf]  ;;  %61 = vperm.xlu1 %1187, %v29_v14  }
   0x6   :  { %120 = vmatprep.subr.mxu0 %v49_v4 }
   0x7   :  { %121 = vmatpush1.msra.mxu0 %v48_v6 }
   0x8   :  { %122 = vmatprep.subr.mxu0 %v47_v8 }
   0x9   :  { %123 = vmatpush1.msra.mxu0 %v46_v9 }
   0xa   :  { %124 = vmatprep.subr.mxu0 %v45_v10 }
   0xb   :  { %11 = vsyncpa [#allocation3], 0  ;;  %125 = vmatpush1.msra.mxu0 %v44_v11  ;;  %v1068_v17 = vld [vmem:[%s1667_s0 + $0x88] sm:$0xff]  ;;  %v28_v18 = vld [vmem:[%s1669_s2] sm:$0xff]  ;;  %71 = vperm.xlu0 %1186, %v31_v15   ;;  %vm215_vm2 = vcmask 261120  }
   0xc   :  { %1041 = vmatmul.mubr.msk.f32.vlgmr.msra.gmra.mxu0 %vm74_vm1, %v24_v12  ;;  %1071 = vmatprep.subr.msk.mxu0 %vm87_vm0, %v1070_v13  ;;  %v1067_v19 = vld [vmem:[%s1667_s0 + $0x80] sm:$0xff]  ;;  %v30_v20 = vld [vmem:[%s1669_s2 + $0x10] sm:$0xff]  ;;  %v25_v21 = vld [vmem:[%s1668_s1 + $0x8] sm:$0xff] }
   0xd   :  { %164 = vmatprep.mubr.f32.mxu0 %v1290_v5  ;;  %1072 = vmatpush1.msk.msra.mxu0 %vm87_vm0, %v1069_v16  ;;  %v1066_v22 = vld [vmem:[%s1667_s0 + $0x78] sm:$0xff]  ;;  %v1065_v23 = vld [vmem:[%s1667_s0 + $0x70] sm:$0xff]  ;;  %v1064_v24 = vld [vmem:[%s1667_s0 + $0x68] sm:$0xff] }
   0xe   :  { %607 = vmatprep.subr.mxu0 %v1068_v17  ;;  %56 = vperm.xlu1 %1187, %v28_v18   ;;  %v1063_v25 = vld [vmem:[%s1667_s0 + $0x60] sm:$0xff]  ;;  %v26_v26 = vld [vmem:[%s1668_s1 + $0x10] sm:$0xff]  ;;  %v1062_v27 = vld [vmem:[%s1667_s0 + $0x58] sm:$0xff] }
   0xf   :  { %608 = vmatpush1.msra.mxu0 %v1067_v19  ;;  %66 = vperm.xlu0 %1186, %v30_v20   ;;  %v1061_v28 = vld [vmem:[%s1667_s0 + $0x50] sm:$0xff]  ;;  %v27_v29 = vld [vmem:[%s1668_s1 + $0x18] sm:$0xff] }
  0x10   :  { %1042 = vmatmul.mubr.msk.f32.gmra.mxu0 %vm74_vm1, %v25_v21  ;;  %609 = vmatprep.subr.mxu0 %v1066_v22  ;;  %v1501_v22 = vld [vmem:[%s1672_s5] sm:$0xff] }
  0x11   :  { %170 = vmatprep.mubr.f32.mxu0 %v1290_v5  ;;  %610 = vmatpush1.msra.mxu0 %v1065_v23 }
  0x12   :  { %611 = vmatprep.subr.mxu0 %v1064_v24  ;;  %1133 = vmatprep.mubr.msk.f32.mxu1 %vm215_vm2, %v1501_v22 }
  0x13   :  { %612 = vmatpush1.msra.mxu0 %v1063_v25 }
  0x14   :  { %1043 = vmatmul.mubr.msk.f32.gmra.mxu0 %vm74_vm1, %v26_v26  ;;  %613 = vmatprep.subr.mxu0 %v1062_v27 }
  0x15   :  { %176 = vmatprep.mubr.f32.mxu0 %v1290_v5  ;;  %614 = vmatpush1.msra.mxu0 %v1061_v28 }
  0x18   :  { %1044 = vmatmul.mubr.msk.f32.gmra.mxu0 %vm74_vm1, %v27_v29 }
  0x19   :  { %647 = vmatprep.mubr.f32.mxu0 %v1290_v5 }
  0x1c   :  { %1073 = vmatmul.mubr.msk.f32.vlgmr.msra.gmra.mxu0 %vm74_vm1, %v24_v12 }
  0x1d   :  { %653 = vmatprep.mubr.f32.mxu0 %v1290_v5 }
  0x20   :  { %1074 = vmatmul.mubr.msk.f32.gmra.mxu0 %vm74_vm1, %v25_v21 }
  0x21   :  { %659 = vmatprep.mubr.f32.mxu0 %v1290_v5 }
  0x24   :  { %1075 = vmatmul.mubr.msk.f32.gmra.mxu0 %vm74_vm1, %v26_v26 }
  0x25   :  { %665 = vmatprep.mubr.f32.mxu0 %v1290_v5 }
  0x28   :  { %1076 = vmatmul.mubr.msk.f32.gmra.mxu0 %vm74_vm1, %v27_v29 }
  0x80   :  { %v62_v43 = vpop.permute.xlu1 %61 }
  0x86   :  { %v72_v32 = vpop.permute.xlu0 %71 }
  0x89   :  { %v57_v55 = vpop.permute.xlu1 %56 }
  0x8a   :  { %v67_v35 = vpop.permute.xlu0 %66 }
  0xcc   :  { %v160_v30 = vpop.f32.mrf.mxu0 }
  0xcd   :  { %v1462_v61 = vadd.f32 %v160_v30, %v57_v55 }
  0xce   :  { %v162_v31 = vpop.f32.mrf.mxu0 }
  0xcf   :  { %v1456_v57 = vadd.f32 %v162_v31, %v57_v55  ;;  %v195_v10 = vmul.f32 %v1462_v61, %v1462_v61 }
  0xd0   :  { %v166_v33 = vpop.f32.mrf.mxu0 }
  0xd1   :  { %v1446_v48 = vadd.f32 %v166_v33, %v62_v43  ;;  %v183_v0 = vadd.f32 %v1456_v57, %v1462_v61  ;;  %v196_v6 = vmul.f32 %v1456_v57, %v1456_v57 }
  0xd2   :  { %v168_v34 = vpop.f32.mrf.mxu0 }
  0xd3   :  { %v1442_v45 = vadd.f32 %v168_v34, %v62_v43  ;;  %v197_v59 = vmul.f32 %v1446_v48, %v1446_v48  ;;  %v203_v14 = vadd.f32 %v196_v6, %v195_v10 }
  0xd4   :  { %v172_v36 = vpop.f32.mrf.mxu0 }
  0xd5   :  { %v1434_v38 = vadd.f32 %v172_v36, %v67_v35  ;;  %v198_v54 = vmul.f32 %v1442_v45, %v1442_v45  ;;  %v186_v58 = vadd.f32 %v1442_v45, %v1446_v48  ;;  %v36_v36 = vld [vmem:[%s1671_s4] sm:$0xff] }
  0xd6   :  { %v174_v37 = vpop.f32.mrf.mxu0 }
  0xd7   :  { %v1436_v39 = vadd.f32 %v174_v37, %v67_v35  ;;  %v206_v62 = vadd.f32 %v198_v54, %v197_v59  ;;  %v199_v3 = vmul.f32 %v1434_v38, %v1434_v38 }
  0xd8   :  { %v178_v40 = vpop.f32.mrf.mxu0 }
  0xd9   :  { %v1438_v41 = vadd.f32 %v178_v40, %v72_v32  ;;  %v189_v42 = vadd.f32 %v1436_v39, %v1434_v38  ;;  %v200_v1 = vmul.f32 %v1436_v39, %v1436_v39 }
  0xda   :  { %v180_v44 = vpop.f32.mrf.mxu0 }
  0xdb   :  { %v1444_v46 = vadd.f32 %v180_v44, %v72_v32  ;;  %190 = vadd.xlane.f32.xlu1 %v189_v42  ;;  %v201_v50 = vmul.f32 %v1438_v41, %v1438_v41  ;;  %v209_v5 = vadd.f32 %v200_v1, %v199_v3 }
  0xdc   :  { %v649_v47 = vpop.f32.mrf.mxu0 }
  0xdd   :  { %v192_v49 = vadd.f32 %v1444_v46, %v1438_v41  ;;  %v202_v51 = vmul.f32 %v1444_v46, %v1444_v46  ;;  %v1488_v17 = vadd.f32 %v649_v47, %v57_v55  ;;  %v41_v47 = vld [vmem:[%s1672_s5 + $0x8] sm:$0xff] }
  0xde   :  { %v651_v52 = vpop.f32.mrf.mxu0 }
  0xdf   :  { %193 = vadd.xlane.f32.xlu0 %v192_v49  ;;  %v212_v53 = vadd.f32 %v202_v51, %v201_v50  ;;  %v1490_v18 = vadd.f32 %v651_v52, %v57_v55  ;;  %v42_v49 = vld [vmem:[%s1672_s5 + $0x10] sm:$0xff]  ;;  %v43_v52 = vld [vmem:[%s1672_s5 + $0x18] sm:$0xff] }
  0xe0   :  { %v655_v56 = vpop.f32.mrf.mxu0 }
  0xe1   :  { %213 = vadd.xlane.f32.xlu1 %v212_v53  ;;  %v1484_v15 = vadd.f32 %v655_v56, %v62_v43  ;;  %v672_v25 = vadd.f32 %v1490_v18, %v1488_v17  ;;  %v685_v33 = vmul.f32 %v1490_v18, %v1490_v18 }
  0xe2   :  { %v657_v60 = vpop.f32.mrf.mxu0 }
  0xe3   :  { %187 = vadd.xlane.f32.xlu0 %v186_v58  ;;  %v1478_v11 = vadd.f32 %v657_v60, %v62_v43  ;;  %v686_v28 = vmul.f32 %v1484_v15, %v1484_v15 }
  0xe4   :  { %v661_v63 = vpop.f32.mrf.mxu0 }
  0xe5   :  { %207 = vadd.xlane.f32.xlu1 %v206_v62  ;;  %v1486_v16 = vadd.f32 %v661_v63, %v67_v35  ;;  %v675_v19 = vadd.f32 %v1478_v11, %v1484_v15  ;;  %v687_v26 = vmul.f32 %v1478_v11, %v1478_v11 }
  0xe6   :  { %v663_v2 = vpop.f32.mrf.mxu0 }
  0xe7   :  { %184 = vadd.xlane.f32.xlu0 %v183_v0  ;;  %v1480_v12 = vadd.f32 %v663_v2, %v67_v35  ;;  %v688_v29 = vmul.f32 %v1486_v16, %v1486_v16  ;;  %v695_v30 = vadd.f32 %v687_v26, %v686_v28  ;;  %v37_v35 = vld [vmem:[%s1671_s4 + $0x8] sm:$0xff] }
  0xe8   :  { %v667_v4 = vpop.f32.mrf.mxu0 }
  0xe9   :  { %v1472_v8 = vadd.f32 %v667_v4, %v72_v32  ;;  %v678_v20 = vadd.f32 %v1480_v12, %v1486_v16  ;;  %v689_v27 = vmul.f32 %v1480_v12, %v1480_v12 }
  0xea   :  { %v669_v7 = vpop.f32.mrf.mxu0 }
  0xeb   :  { %v1474_v9 = vadd.f32 %v669_v7, %v72_v32  ;;  %210 = vadd.xlane.f32.xlu0 %v209_v5  ;;  %v690_v23 = vmul.f32 %v1472_v8, %v1472_v8  ;;  %v698_v31 = vadd.f32 %v689_v27, %v688_v29  ;;  %v684_v32 = vmul.f32 %v1488_v17, %v1488_v17 }
  0xed   :  { %v681_v13 = vadd.f32 %v1474_v9, %v1472_v8  ;;  %v691_v21 = vmul.f32 %v1474_v9, %v1474_v9  ;;  %v692_v34 = vadd.f32 %v685_v33, %v684_v32 }
  0xef   :  { %682 = vadd.xlane.f32.xlu1 %v681_v13  ;;  %204 = vadd.xlane.f32.xlu0 %v203_v14  ;;  %v701_v24 = vadd.f32 %v691_v21, %v690_v23 }
  0xf3   :  { %676 = vadd.xlane.f32.xlu1 %v675_v19  ;;  %679 = vadd.xlane.f32.xlu0 %v678_v20 }
  0xf7   :  { %702 = vadd.xlane.f32.xlu1 %v701_v24  ;;  %673 = vadd.xlane.f32.xlu0 %v672_v25 }
  0xfb   :  { %696 = vadd.xlane.f32.xlu1 %v695_v30  ;;  %699 = vadd.xlane.f32.xlu0 %v698_v31 }
  0xff   :  { %693 = vadd.xlane.f32.xlu0 %v692_v34  ;;  %v33_v34 = vld [vmem:[%s1670_s3 + $0x8] sm:$0xff] }
 0x10c   :  { %481 = vperm.xlu1 %1187, %v37_v35  }
 0x115   :  { %476 = vperm.xlu0 %1186, %v36_v36  }
 0x164   :  { %v191_v40 = vpop.xlane.xlu1 %190 }
 0x168   :  { %v194_v37 = vpop.xlane.xlu0 %193 }
 0x169   :  { %1125 = vmatprep.subr.mxu1 %v194_v37 }
 0x16a   :  { %1126 = vmatpush3.msra.mxu1 %v194_v37  ;;  %v214_v43 = vpop.xlane.xlu1 %213 }
 0x16b   :  { %1127 = vmatprep.subr.mxu1 %v191_v40 }
 0x16c   :  { %1128 = vmatpush3.msra.mxu1 %v191_v40  ;;  %v188_v42 = vpop.xlane.xlu0 %187 }
 0x16d   :  { %1129 = vmatprep.subr.mxu1 %v188_v42 }
 0x16e   :  { %1130 = vmatpush3.msra.mxu1 %v188_v42  ;;  %v208_v50 = vpop.xlane.xlu1 %207  ;;  %v32_v42 = vld [vmem:[%s1670_s3] sm:$0xff] }
 0x170   :  { %v185_v44 = vpop.xlane.xlu0 %184 }
 0x171   :  { %1131 = vmatprep.subr.mxu1 %v185_v44 }
 0x172   :  { %1132 = vmatpush3.msra.mxu1 %v185_v44 }
 0x173   :  { %1134 = vmatmul.mubr.msk.f32.vlgmr.msra.gmra.mxu1 %vm215_vm2, %v41_v47  ;;  %1139 = vmatprep.subr.mxu1 %v214_v43 }
 0x174   :  { %1140 = vmatpush3.msra.mxu1 %v214_v43  ;;  %v211_v51 = vpop.xlane.xlu0 %210  ;;  %1136 = vmatprep.mubr.msk.f32.mxu1 %vm215_vm2, %v42_v49 }
 0x175   :  { %1141 = vmatprep.subr.mxu1 %v211_v51 }
 0x176   :  { %1142 = vmatpush3.msra.mxu1 %v211_v51 }
 0x177   :  { %1137 = vmatmul.mubr.msk.f32.gmra.mxu1 %vm215_vm2, %v43_v52  ;;  %1143 = vmatprep.subr.mxu1 %v208_v50 }
 0x178   :  { %v683_v53 = vpop.xlane.xlu1 %682  ;;  %1144 = vmatpush3.msra.mxu1 %v208_v50  ;;  %v205_v54 = vpop.xlane.xlu0 %204  ;;  %1147 = vmatprep.mubr.msk.f32.mxu1 %vm215_vm2, %v1501_v22 }
 0x179   :  { %1145 = vmatprep.subr.mxu1 %v205_v54 }
 0x17a   :  { %1146 = vmatpush3.msra.mxu1 %v205_v54 }
 0x17b   :  { %1148 = vmatmul.mubr.msk.f32.vlgmr.msra.gmra.mxu1 %vm215_vm2, %v41_v47  ;;  %1153 = vmatprep.subr.mxu1 %v683_v53 }
 0x17c   :  { %v677_v55 = vpop.xlane.xlu1 %676  ;;  %1154 = vmatpush3.msra.mxu1 %v683_v53  ;;  %v680_v56 = vpop.xlane.xlu0 %679  ;;  %1150 = vmatprep.mubr.msk.f32.mxu1 %vm215_vm2, %v42_v49  ;;  %v35_v53 = vld [vmem:[%s1670_s3 + $0x18] sm:$0xff] }
 0x17d   :  { %1155 = vmatprep.subr.mxu1 %v680_v56 }
 0x17e   :  { %1156 = vmatpush3.msra.mxu1 %v680_v56 }
 0x17f   :  { %1151 = vmatmul.mubr.msk.f32.gmra.mxu1 %vm215_vm2, %v43_v52  ;;  %1157 = vmatprep.subr.mxu1 %v677_v55 }
 0x180   :  { %v703_v58 = vpop.xlane.xlu1 %702  ;;  %1158 = vmatpush3.msra.mxu1 %v677_v55  ;;  %v674_v59 = vpop.xlane.xlu0 %673  ;;  %1161 = vmatprep.mubr.msk.f32.mxu1 %vm215_vm2, %v1501_v22 }
 0x181   :  { %1159 = vmatprep.subr.mxu1 %v674_v59 }
 0x182   :  { %1160 = vmatpush3.msra.mxu1 %v674_v59 }
 0x183   :  { %1162 = vmatmul.mubr.msk.f32.vlgmr.msra.gmra.mxu1 %vm215_vm2, %v41_v47  ;;  %1167 = vmatprep.subr.mxu1 %v703_v58 }
 0x184   :  { %1168 = vmatpush3.msra.mxu1 %v703_v58  ;;  %v700_v60 = vpop.xlane.xlu0 %699  ;;  %1164 = vmatprep.mubr.msk.f32.mxu1 %vm215_vm2, %v42_v49  ;;  %v697_v62 = vpop.xlane.xlu1 %696 }
 0x185   :  { %1169 = vmatprep.subr.mxu1 %v700_v60 }
 0x186   :  { %1170 = vmatpush3.msra.mxu1 %v700_v60  ;;  %v34_v60 = vld [vmem:[%s1670_s3 + $0x10] sm:$0xff] }
 0x187   :  { %1165 = vmatmul.mubr.msk.f32.gmra.mxu1 %vm215_vm2, %v43_v52  ;;  %1171 = vmatprep.subr.mxu1 %v697_v62 }
 0x188   :  { %1172 = vmatpush3.msra.mxu1 %v697_v62  ;;  %v694_v63 = vpop.xlane.xlu0 %693  ;;  %1175 = vmatprep.mubr.msk.f32.mxu1 %vm215_vm2, %v1501_v22 }
 0x189   :  { %1173 = vmatprep.subr.mxu1 %v694_v63 }
 0x18a   :  { %1174 = vmatpush3.msra.mxu1 %v694_v63 }
 0x18b   :  { %1176 = vmatmul.mubr.msk.f32.vlgmr.msra.gmra.mxu1 %vm215_vm2, %v41_v47 }
 0x18c   :  { %1178 = vmatprep.mubr.msk.f32.mxu1 %vm215_vm2, %v42_v49 }
 0x18f   :  { %1179 = vmatmul.mubr.msk.f32.gmra.mxu1 %vm215_vm2, %v43_v52 }
 0x233   :  { %v1135_v0 = vpop.f32.mrf.mxu1 }
 0x234   :  { %421 = vperm.xlu0 %1186, %v1135_v0   ;;  %v399_v4 = vmul.f32 %v1135_v0, %v1135_v0 }
 0x235   :  { %v294_v1 = vpop.f32.mrf.mxu1 }
 0x236   :  { %416 = vperm.xlu1 %1187, %v294_v1   ;;  %v398_v6 = vmul.f32 %v294_v1, %v294_v1 }
 0x237   :  { %v1138_v2 = vpop.f32.mrf.mxu1 }
 0x238   :  { %v401_v13 = vmul.f32 %v1138_v2, %v1138_v2 }
 0x239   :  { %v304_v3 = vpop.f32.mrf.mxu1 }
 0x23a   :  { %431 = vperm.xlu1 %1187, %v1138_v2   ;;  %v400_v21 = vmul.f32 %v304_v3, %v304_v3 }
 0x23b   :  { %v1149_v5 = vpop.f32.mrf.mxu1 }
 0x23c   :  { %v403_v7 = vsub.f32 %v1149_v5, %v399_v4 }
 0x23d   :  { %v379_v10 = vpop.f32.mrf.mxu1 }
 0x23e   :  { %v407_v14 = vadd.f32 1e-05, %v403_v7  ;;  %v402_v19 = vsub.f32 %v379_v10, %v398_v6  ;;  %426 = vperm.xlu1 %1187, %v304_v3  }
 0x23f   :  { %v1152_v20 = vpop.f32.mrf.mxu1 }
 0x240   :  { %1188 = vrsqrt.f32 %v407_v14  ;;  %v406_v22 = vadd.f32 1e-05, %v402_v19  ;;  %v405_v23 = vsub.f32 %v1152_v20, %v401_v13  ;;  %v39_v20 = vld [vmem:[%s1671_s4 + $0x18] sm:$0xff] }
 0x241   :  { %v389_v24 = vpop.f32.mrf.mxu1 }
 0x242   :  { %1190 = vrsqrt.f32 %v406_v22  ;;  %v409_v25 = vadd.f32 1e-05, %v405_v23  ;;  %v404_v26 = vsub.f32 %v389_v24, %v400_v21  ;;  %v38_v21 = vld [vmem:[%s1671_s4 + $0x10] sm:$0xff]  ;;  %v482_v22 = vpop.permute.xlu1 %481  ;;  %s1292_s4 = smov [#allocation2]  }
 0x243   :  { %v1163_v27 = vpop.f32.mrf.mxu1  ;;  %s1028_s23 = sshll.u32 %s1292_s4, 4  ;;  %s1029_s23 = int_to_ptr.vmem [resolvable:$true] %s1028_s23 }
 0x244   :  { %1192 = vrsqrt.f32 %v409_v25  ;;  %v408_v28 = vadd.f32 1e-05, %v404_v26  ;;  %897 = vperm.xlu1 %1187, %v1163_v27   ;;  %v875_v32 = vmul.f32 %v1163_v27, %v1163_v27  ;;  %v477_v25 = vpop.permute.xlu0 %476  ;;  %s1268_s24 = scalar_lea.vmem %s1029_s23, 2048  ;;  %p1273_p1 = scmp.lt.s32.totalorder %s1029_s23, %s1029_s23 }
 0x245   :  { %v770_v29 = vpop.f32.mrf.mxu1  ;;  %p1269_p0 = scmp.ne.s32.totalorder %s1029_s23, %s1268_s24  ;;  %p1274_p2 = scmp.lt.s32.totalorder %s1268_s24, %s1268_s24 }
 0x246   :  { %1194 = vrsqrt.f32 %v408_v28  ;;  %892 = vperm.xlu0 %1186, %v770_v29   ;;  %v874_v35 = vmul.f32 %v770_v29, %v770_v29 }
 0x247   :  { %v1166_v30 = vpop.f32.mrf.mxu1  ;;  %p1275_p3 = por %p1274_p2, %p1273_p1 }
 0x248   :  { %907 = vperm.xlu1 %1187, %v1166_v30   ;;  %v877_v43 = vmul.f32 %v1166_v30, %v1166_v30 }
 0x249   :  { %v780_v31 = vpop.f32.mrf.mxu1  ;;  %p1276_p4 = pnand %p1275_p3, %p1269_p0 }
 0x24a   :  { %902 = vperm.xlu0 %1186, %v780_v31   ;;  %v876_v51 = vmul.f32 %v780_v31, %v780_v31 }
 0x24b   :  { %v1177_v33 = vpop.f32.mrf.mxu1 }
 0x24c   :  { %v879_v36 = vsub.f32 %v1177_v33, %v875_v32 }
 0x24d   :  { %v1189_v37 = vpop.eup %1188  ;;  %v855_v40 = vpop.f32.mrf.mxu1 }
 0x24e   :  { %v883_v44 = vadd.f32 1e-05, %v879_v36  ;;  %v878_v47 = vsub.f32 %v855_v40, %v874_v35  ;;  %v443_v49 = vmul.f32 %v1189_v37, %v33_v34 }
 0x24f   :  { %v1191_v50 = vpop.eup %1190  ;;  %v1180_v52 = vpop.f32.mrf.mxu1 }
 0x250   :  { %1196 = vrsqrt.f32 %v883_v44  ;;  %v882_v54 = vadd.f32 1e-05, %v878_v47  ;;  %v881_v55 = vsub.f32 %v1180_v52, %v877_v43  ;;  %453 = vperm.xlu1 %1187, %v443_v49   ;;  %v442_v56 = vmul.f32 %v1191_v50, %v32_v42 }
 0x251   :  { %v1193_v58 = vpop.eup %1192  ;;  %v865_v59 = vpop.f32.mrf.mxu1 }
 0x252   :  { %1198 = vrsqrt.f32 %v882_v54  ;;  %v885_v62 = vadd.f32 1e-05, %v881_v55  ;;  %v880_v63 = vsub.f32 %v865_v59, %v876_v51  ;;  %448 = vperm.xlu0 %1186, %v442_v56   ;;  %v445_v0 = vmul.f32 %v1193_v58, %v35_v53 }
 0x253   :  { %v1195_v1 = vpop.eup %1194 }
 0x254   :  { %1200 = vrsqrt.f32 %v885_v62  ;;  %v884_v2 = vadd.f32 1e-05, %v880_v63  ;;  %463 = vperm.xlu1 %1187, %v445_v0   ;;  %v444_v3 = vmul.f32 %v1195_v1, %v34_v60 }
 0x256   :  { %1202 = vrsqrt.f32 %v884_v2  ;;  %458 = vperm.xlu0 %1186, %v444_v3  }
 0x25d   :  { %v1197_v4 = vpop.eup %1196 }
 0x25e   :  { %v919_v5 = vmul.f32 %v1197_v4, %v33_v34 }
 0x25f   :  { %v1199_v6 = vpop.eup %1198 }
 0x260   :  { %929 = vperm.xlu1 %1187, %v919_v5   ;;  %v918_v7 = vmul.f32 %v1199_v6, %v32_v42 }
 0x261   :  { %v1201_v10 = vpop.eup %1200 }
 0x262   :  { %924 = vperm.xlu0 %1186, %v918_v7   ;;  %v921_v13 = vmul.f32 %v1201_v10, %v35_v53 }
 0x263   :  { %v1203_v14 = vpop.eup %1202 }
 0x264   :  { %939 = vperm.xlu1 %1187, %v921_v13   ;;  %v920_v19 = vmul.f32 %v1203_v14, %v34_v60 }
 0x266   :  { %934 = vperm.xlu0 %1186, %v920_v19  }
 0x268   :  { %491 = vperm.xlu1 %1187, %v39_v20  }
 0x26a   :  { %486 = vperm.xlu0 %1186, %v38_v21  }
 0x2af   :  { %v422_v27 = vpop.permute.xlu0 %421 }
 0x2b0   :  { %v436_v32 = vsub.f32 %v1446_v48, %v422_v27  ;;  %v437_v33 = vsub.f32 %v1442_v45, %v422_v27 }
 0x2b1   :  { %v417_v23 = vpop.permute.xlu1 %416 }
 0x2b2   :  { %v434_v35 = vsub.f32 %v1462_v61, %v417_v23  ;;  %v435_v36 = vsub.f32 %v1456_v57, %v417_v23 }
 0x2b5   :  { %v432_v24 = vpop.permute.xlu1 %431 }
 0x2b6   :  { %v440_v63 = vsub.f32 %v1438_v41, %v432_v24  ;;  %v441_v0 = vsub.f32 %v1444_v46, %v432_v24 }
 0x2b9   :  { %v1572_v26 = vpop.permute.xlu1 %426 }
 0x2ba   :  { %v438_v1 = vsub.f32 %v1434_v38, %v1572_v26  ;;  %v439_v2 = vsub.f32 %v1436_v39, %v1572_v26 }
 0x2bf   :  { %v898_v28 = vpop.permute.xlu1 %897 }
 0x2c0   :  { %v912_v54 = vsub.f32 %v1484_v15, %v898_v28  ;;  %v913_v55 = vsub.f32 %v1478_v11, %v898_v28 }
 0x2c1   :  { %v893_v29 = vpop.permute.xlu0 %892 }
 0x2c2   :  { %v910_v58 = vsub.f32 %v1488_v17, %v893_v29  ;;  %v911_v59 = vsub.f32 %v1490_v18, %v893_v29 }
 0x2c3   :  { %v1574_v30 = vpop.permute.xlu1 %907 }
 0x2c4   :  { %v916_v5 = vsub.f32 %v1472_v8, %v1574_v30  ;;  %v917_v41 = vsub.f32 %v1474_v9, %v1574_v30 }
 0x2c5   :  { %v1576_v31 = vpop.permute.xlu0 %902 }
 0x2c6   :  { %v914_v38 = vsub.f32 %v1486_v16, %v1576_v31  ;;  %v915_v39 = vsub.f32 %v1480_v12, %v1576_v31 }
 0x2cb   :  { %v454_v34 = vpop.permute.xlu1 %453 }
 0x2cc   :  { %v468_v37 = vmul.f32 %v454_v34, %v436_v32  ;;  %v469_v40 = vmul.f32 %v454_v34, %v437_v33 }
 0x2cd   :  { %v449_v42 = vpop.permute.xlu0 %448 }
 0x2ce   :  { %v1582_v43 = vadd.f32 %v482_v22, %v468_v37  ;;  %v1584_v44 = vadd.f32 %v482_v22, %v469_v40  ;;  %v466_v47 = vmul.f32 %v449_v42, %v434_v35  ;;  %v467_v49 = vmul.f32 %v449_v42, %v435_v36 }
 0x2cf   :  { %v464_v52 = vpop.permute.xlu1 %463 }
 0x2d0   :  { %v1055_v50 = vmul.f32 -1.442695, %v1582_v43  ;;  %v1056_v48 = vmul.f32 -1.442695, %v1584_v44  ;;  %v1588_v51 = vadd.f32 %v477_v25, %v466_v47  ;;  %v1590_v45 = vadd.f32 %v477_v25, %v467_v49 }
 0x2d1   :  { %v459_v53 = vpop.permute.xlu0 %458  ;;  %v472_v10 = vmul.f32 %v464_v52, %v440_v63  ;;  %v473_v13 = vmul.f32 %v464_v52, %v441_v0 }
 0x2d2   :  { %1204 = vpow2.f32 %v1055_v50  ;;  %v1053_v57 = vmul.f32 -1.442695, %v1588_v51  ;;  %v1054_v61 = vmul.f32 -1.442695, %v1590_v45  ;;  %v470_v21 = vmul.f32 %v459_v53, %v438_v1 }
 0x2d3   :  { %1206 = vpow2.f32 %v1056_v48  ;;  %v471_v32 = vmul.f32 %v459_v53, %v439_v2 }
 0x2d4   :  { %1208 = vpow2.f32 %v1053_v57 }
 0x2d5   :  { %1210 = vpow2.f32 %v1054_v61 }
 0x2db   :  { %v930_v56 = vpop.permute.xlu1 %929 }
 0x2dc   :  { %v944_v60 = vmul.f32 %v930_v56, %v912_v54  ;;  %v945_v62 = vmul.f32 %v930_v56, %v913_v55 }
 0x2dd   :  { %v925_v15 = vpop.permute.xlu0 %924 }
 0x2de   :  { %v1604_v3 = vadd.f32 %v944_v60, %v482_v22  ;;  %v1606_v11 = vadd.f32 %v945_v62, %v482_v22  ;;  %v942_v17 = vmul.f32 %v925_v15, %v910_v58  ;;  %v943_v4 = vmul.f32 %v925_v15, %v911_v59 }
 0x2df   :  { %v1205_v18 = vpop.eup %1204  ;;  %v940_v46 = vpop.permute.xlu1 %939 }
 0x2e0   :  { %v1207_v6 = vpop.eup %1206  ;;  %v528_v7 = vadd.f32 1.0, %v1205_v18  ;;  %v1616_v14 = vadd.f32 %v942_v17, %v477_v25  ;;  %v1087_v8 = vmul.f32 -1.442695, %v1604_v3  ;;  %v1619_v22 = vadd.f32 %v943_v4, %v477_v25 }
 0x2e1   :  { %v1209_v19 = vpop.eup %1208  ;;  %v529_v20 = vadd.f32 1.0, %v1207_v6  ;;  %v935_v9 = vpop.permute.xlu0 %934  ;;  %v1088_v12 = vmul.f32 -1.442695, %v1606_v11  ;;  %v948_v24 = vmul.f32 %v940_v46, %v916_v5  ;;  %v949_v28 = vmul.f32 %v940_v46, %v917_v41 }
 0x2e2   :  { %v1211_v23 = vpop.eup %1210  ;;  %1212 = vrcp.f32 %v528_v7  ;;  %v526_v16 = vadd.f32 1.0, %v1209_v19  ;;  %v1085_v27 = vmul.f32 -1.442695, %v1616_v14  ;;  %v1086_v33 = vmul.f32 -1.442695, %v1619_v22 }
 0x2e3   :  { %1214 = vrcp.f32 %v529_v20  ;;  %v527_v26 = vadd.f32 1.0, %v1211_v23  ;;  %v492_v29 = vpop.permute.xlu1 %491  ;;  %v946_v36 = vmul.f32 %v935_v9, %v914_v38  ;;  %v947_v37 = vmul.f32 %v935_v9, %v915_v39 }
 0x2e4   :  { %1216 = vrcp.f32 %v526_v16  ;;  %v1623_v30 = vadd.f32 %v492_v29, %v472_v10  ;;  %v1625_v31 = vadd.f32 %v492_v29, %v473_v13  ;;  %v1627_v25 = vadd.f32 %v948_v24, %v492_v29 }
 0x2e5   :  { %1218 = vrcp.f32 %v527_v26  ;;  %v1630_v34 = vadd.f32 %v949_v28, %v492_v29  ;;  %v487_v35 = vpop.permute.xlu0 %486 }
 0x2e6   :  { %1220 = vpow2.f32 %v1087_v8  ;;  %v1059_v40 = vmul.f32 -1.442695, %v1623_v30  ;;  %v1060_v42 = vmul.f32 -1.442695, %v1625_v31  ;;  %v1634_v47 = vadd.f32 %v487_v35, %v470_v21 }
 0x2e7   :  { %1222 = vpow2.f32 %v1088_v12  ;;  %v1636_v49 = vadd.f32 %v487_v35, %v471_v32  ;;  %v1091_v50 = vmul.f32 -1.442695, %v1627_v25  ;;  %v1639_v48 = vadd.f32 %v946_v36, %v487_v35 }
 0x2e8   :  { %1224 = vpow2.f32 %v1085_v27  ;;  %v1092_v57 = vmul.f32 -1.442695, %v1630_v34  ;;  %v1642_v61 = vadd.f32 %v947_v37, %v487_v35  ;;  %v1057_v52 = vmul.f32 -1.442695, %v1634_v47 }
 0x2e9   :  { %1226 = vpow2.f32 %v1086_v33  ;;  %v1058_v53 = vmul.f32 -1.442695, %v1636_v49  ;;  %v1089_v54 = vmul.f32 -1.442695, %v1639_v48 }
 0x2ea   :  { %1228 = vpow2.f32 %v1059_v40  ;;  %v1090_v55 = vmul.f32 -1.442695, %v1642_v61 }
 0x2eb   :  { %1230 = vpow2.f32 %v1060_v42 }
 0x2ec   :  { %1232 = vpow2.f32 %v1091_v50 }
 0x2ed   :  { %1234 = vpow2.f32 %v1092_v57 }
 0x2ee   :  { %1236 = vpow2.f32 %v1057_v52 }
 0x2ef   :  { %v1213_v56 = vpop.eup %1212  ;;  %1238 = vpow2.f32 %v1058_v53 }
 0x2f0   :  { %v1215_v58 = vpop.eup %1214  ;;  %v552_v59 = vmul.f32 %v1213_v56, %v1582_v43  ;;  %1240 = vpow2.f32 %v1089_v54 }
 0x2f1   :  { %v1217_v60 = vpop.eup %1216  ;;  %v553_v62 = vmul.f32 %v1215_v58, %v1584_v44  ;;  %1242 = vpow2.f32 %v1090_v55 }
 0x2f2   :  { %v1219_v63 = vpop.eup %1218  ;;  %560 = vst [vmem:[#allocation2 + $0x10] sm:$0xff] %v552_v59  ;;  %v550_v0 = vmul.f32 %v1217_v60, %v1588_v51 }
 0x2f3   :  { %v1221_v1 = vpop.eup %1220  ;;  %561 = vst [vmem:[#allocation2 + $0x18] sm:$0xff] %v553_v62  ;;  %v551_v2 = vmul.f32 %v1219_v63, %v1590_v45 }
 0x2f4   :  { %v1223_v15 = vpop.eup %1222  ;;  %558 = vst [vmem:[#allocation2] sm:$0xff] %v550_v0  ;;  %v984_v17 = vadd.f32 1.0, %v1221_v1 }
 0x2f5   :  { %v1225_v4 = vpop.eup %1224  ;;  %559 = vst [vmem:[#allocation2 + $0x8] sm:$0xff] %v551_v2  ;;  %v985_v18 = vadd.f32 1.0, %v1223_v15 }
 0x2f6   :  { %v1227_v43 = vpop.eup %1226  ;;  %1244 = vrcp.f32 %v984_v17  ;;  %v982_v5 = vadd.f32 1.0, %v1225_v4 }
 0x2f7   :  { %v1229_v41 = vpop.eup %1228  ;;  %1246 = vrcp.f32 %v985_v18  ;;  %v983_v44 = vadd.f32 1.0, %v1227_v43 }
 0x2f8   :  { %v1231_v38 = vpop.eup %1230  ;;  %1248 = vrcp.f32 %v982_v5  ;;  %v532_v39 = vadd.f32 1.0, %v1229_v41 }
 0x2f9   :  { %v1233_v51 = vpop.eup %1232  ;;  %1250 = vrcp.f32 %v983_v44  ;;  %v533_v46 = vadd.f32 1.0, %v1231_v38 }
 0x2fa   :  { %v1235_v6 = vpop.eup %1234  ;;  %1252 = vrcp.f32 %v532_v39  ;;  %v988_v45 = vadd.f32 1.0, %v1233_v51 }
 0x2fb   :  { %v1237_v7 = vpop.eup %1236  ;;  %1254 = vrcp.f32 %v533_v46  ;;  %v989_v10 = vadd.f32 1.0, %v1235_v6 }
 0x2fc   :  { %v1239_v13 = vpop.eup %1238  ;;  %1256 = vrcp.f32 %v988_v45  ;;  %v530_v19 = vadd.f32 1.0, %v1237_v7 }
 0x2fd   :  { %v1241_v20 = vpop.eup %1240  ;;  %1258 = vrcp.f32 %v989_v10  ;;  %v531_v21 = vadd.f32 1.0, %v1239_v13 }
 0x2fe   :  { %v1243_v8 = vpop.eup %1242  ;;  %1260 = vrcp.f32 %v530_v19  ;;  %v986_v9 = vadd.f32 1.0, %v1241_v20 }
 0x2ff   :  { %1262 = vrcp.f32 %v531_v21  ;;  %v987_v23 = vadd.f32 1.0, %v1243_v8 }
 0x300   :  { %1264 = vrcp.f32 %v986_v9 }
 0x301   :  { %1266 = vrcp.f32 %v987_v23 }
 0x303   :  { %v1245_v16 = vpop.eup %1244 }
 0x304   :  { %v1247_v12 = vpop.eup %1246  ;;  %v1008_v24 = vmul.f32 %v1245_v16, %v1604_v3 }
 0x305   :  { %v1249_v26 = vpop.eup %1248  ;;  %v1009_v27 = vmul.f32 %v1247_v12, %v1606_v11 }
 0x306   :  { %v1251_v28 = vpop.eup %1250  ;;  %1017 = vst [vmem:[#allocation2 + $0x50] sm:$0xff] %v1008_v24  ;;  %v1006_v29 = vmul.f32 %v1249_v26, %v1616_v14 }
 0x307   :  { %v1253_v32 = vpop.eup %1252  ;;  %1018 = vst [vmem:[#allocation2 + $0x58] sm:$0xff] %v1009_v27  ;;  %v1007_v33 = vmul.f32 %v1251_v28, %v1619_v22 }
 0x308   :  { %v1255_v35 = vpop.eup %1254  ;;  %1015 = vst [vmem:[#allocation2 + $0x40] sm:$0xff] %v1006_v29  ;;  %v556_v36 = vmul.f32 %v1253_v32, %v1623_v30 }
 0x309   :  { %v1257_v37 = vpop.eup %1256  ;;  %1016 = vst [vmem:[#allocation2 + $0x48] sm:$0xff] %v1007_v33  ;;  %v557_v40 = vmul.f32 %v1255_v35, %v1625_v31 }
 0x30a   :  { %v1259_v3 = vpop.eup %1258  ;;  %564 = vst [vmem:[#allocation2 + $0x30] sm:$0xff] %v556_v36  ;;  %v1012_v11 = vmul.f32 %v1257_v37, %v1627_v25 }
 0x30b   :  { %v1261_v42 = vpop.eup %1260  ;;  %565 = vst [vmem:[#allocation2 + $0x38] sm:$0xff] %v557_v40  ;;  %v1013_v14 = vmul.f32 %v1259_v3, %v1630_v34 }
 0x30c   :  { %v1263_v50 = vpop.eup %1262  ;;  %1021 = vst [vmem:[#allocation2 + $0x70] sm:$0xff] %v1012_v11  ;;  %v554_v22 = vmul.f32 %v1261_v42, %v1634_v47 }
 0x30d   :  { %v1265_v57 = vpop.eup %1264  ;;  %1022 = vst [vmem:[#allocation2 + $0x78] sm:$0xff] %v1013_v14  ;;  %v555_v30 = vmul.f32 %v1263_v50, %v1636_v49 }
 0x30e   :  { %v1267_v52 = vpop.eup %1266  ;;  %562 = vst [vmem:[#allocation2 + $0x20] sm:$0xff] %v554_v22  ;;  %v1010_v31 = vmul.f32 %v1265_v57, %v1639_v48 }
 0x30f   :  { %563 = vst [vmem:[#allocation2 + $0x28] sm:$0xff] %v555_v30  ;;  %v1011_v25 = vmul.f32 %v1267_v52, %v1642_v61 }
 0x310   :  { %1019 = vst [vmem:[#allocation2 + $0x60] sm:$0xff] %v1010_v31 }
 0x311   :  { %1020 = vst [vmem:[#allocation2 + $0x68] sm:$0xff] %v1011_v25 }
 0x312   :  { %1279 = shalt.err (!%p1276_p4)
}
 0x313   :  { %s1293_s25 = smov 256   ;;  %s1294_s26 = smov 16  }
 0x314   :  { %1034 = dma.vmem_to_hbm [thread:$0]  %s1029_s23, 2048, %s1673_s6, [#allocation3], %s1293_s25, %s1293_s25, %s1294_s26  }
 0x315   :  { %1288 = dma.done.wait [#allocation3], 2048  }
 0x316   :  { %1289 = vsyncadd [#allocation3], 4294965248 }
 0x317   :  { %1038 = vsyncpa [#allocation3], 1 }

</bundles_post_ra>
